<compile_context>
chip_gen: v7x
topology: tpu7x:2x2x1
jax: 0.10.0
libtpu: 0.0.40
codegen_flags: <defaults>
</compile_context>

<pallas_src>
import functools
import math

import numpy as np
import jax
import jax.numpy as jnp
from jax.experimental import pallas as pl
from jax.experimental.pallas import tpu as pltpu


OUT_LANES = 128          # lane-dense output slab width (>= Wo3)


# ------------------------------ Pallas kernel --------------------------------
def _fused_encoder_kernel(x_ref, m1_ref, b1_ref, m2_ref, b2_ref, m3_ref, b3_ref,
                          o_ref, *, ho1):
    """One batch tile: conv1+ReLU -> conv2+ReLU -> conv3, all VMEM/vreg resident.

    x_ref : (1, ho1*b_tile, kh*Wp1*Cin)  pre-gathered kh-row windows, ho-major rows.
    m1_ref: (kh*Wp1*Cin, Wo1*Ch)         layer-1 Toeplitz weights.
    m2_ref: (Ho1*Wo1*Ch, Wo2*Ch)         layer-2 Toeplitz weights (padding folded in).
    m3_ref: (Wo2*Ch, OUT_LANES)          layer-3 weights, zero-padded to 128 lanes.
    b3_ref: (1, OUT_LANES)               layer-3 bias, zero-padded to 128 lanes.
    o_ref : (1, b_tile, OUT_LANES)       lane-dense output slab; lanes [0, Wo3) real.
    """
    b_tile = o_ref.shape[1]
    xi = x_ref[0]                                        # (ho1*b_tile, kh*Wp1*Cin)

    # ---- layer 1: single MXU matmul over the full K = kh*Wp1*Cin window ----
    l1 = jnp.dot(xi, m1_ref[...], preferred_element_type=jnp.float32)
    l1 = jnp.maximum(l1 + b1_ref[...], 0.0)              # (ho1*b_tile, Wo1*Ch)

    # ---- layer 2: accumulate over the ho1 conv1 rows of each sample.
    # Rows for a fixed k are contiguous (ho-major ordering done in the wrapper), so
    # each partial is a plain (b_tile, 256) x (256, 128) matmul -- no gathers.
    kc = m2_ref.shape[0] // ho1                          # Wo1 * Ch

    def l1k(k):
        return l1[k * b_tile:(k + 1) * b_tile, :].astype(m2_ref.dtype)

    acc2 = jnp.dot(l1k(0), m2_ref[:kc, :], preferred_element_type=jnp.float32)
    for k in range(1, ho1):
        acc2 = acc2 + jnp.dot(l1k(k), m2_ref[k * kc:(k + 1) * kc, :],
                              preferred_element_type=jnp.float32)
    l2 = jnp.maximum(acc2 + b2_ref[...], 0.0)            # (b_tile, Wo2*Ch)

    # ---- layer 3: ONE MXU matmul against lane-padded weights, lane-dense store ----
    o_ref[0] = (jnp.dot(l2.astype(m3_ref.dtype), m3_ref[...],
                        preferred_element_type=jnp.float32) + b3_ref[...])


# --------------------- init-time (hoisted) weight preparation -----------------
def _conv_out(n, k, p, s):
    return (n + 2 * p - k) // s + 1


def _toeplitz_layer1(w, b, wp, sw, wout):
    """(Cout,Cin,kh,kw) -> (kh*wp*Cin, wout*Cout); X rows are kh stacked *padded* rows."""
    cout, cin, kh, kw = w.shape
    w = np.asarray(w, np.float32)
    mat = np.zeros((kh * wp * cin, wout * cout), np.float32)
    for i in range(kh):
        for wo in range(wout):
            for j in range(kw):
                col = wo * sw + j                        # padded input column
                r0 = (i * wp + col) * cin
                mat[r0:r0 + cin, wo * cout:(wo + 1) * cout] = w[:, :, i, j].T
    bias = np.tile(np.asarray(b, np.float32), wout).reshape(1, wout * cout)
    return mat, bias


def _toeplitz_single_row(w, b, hin, win, ph, pw, sw, wout):
    """Layers whose output height is 1: X is the unpadded (hin, win*Cin) activation,
    rows stacked along lanes; the zero padding is folded into the matrix."""
    cout, cin, kh, kw = w.shape
    w = np.asarray(w, np.float32)
    mat = np.zeros((hin * win * cin, wout * cout), np.float32)
    for k in range(hin):
        i = k + ph                                       # kernel row hit by input row k
        if not 0 <= i < kh:
            continue
        for wo in range(wout):
            for j in range(kw):
                col = wo * sw + j - pw                   # unpadded input column
                if not 0 <= col < win:
                    continue
                r0 = (k * win + col) * cin
                mat[r0:r0 + cin, wo * cout:(wo + 1) * cout] = w[:, :, i, j].T
    bias = np.tile(np.asarray(b, np.float32), wout).reshape(1, wout * cout)
    return mat, bias


# ------------------------------- jitted forward -------------------------------
def _encoder_forward(x_nchw, params, *, kh, sh, ph, pw, ho1, wo3, out_lanes):
    m1, v1, m2, v2, m3, v3 = params
    N, C, H, W = x_nchw.shape
    hp, wpc = H + 2 * ph, (W + 2 * pw) * C
    k1 = kh * wpc                                        # layer-1 contraction size

    # ---- batch-tile policy (static under jit) --------------------------------
    #  * aim for ~256 MXU M-rows per grid step (b_tile*ho1), capped at b_tile=64
    #  * keep >=2 "parallel" grid steps whenever N > 1 so both v7x TCs get work
    if N == 1:
        b_tile = 1
    elif N < 16:
        b_tile = -(-N // 2)
    else:
        b_tile = min(64, ((-(-N // 2)) + 7) // 8 * 8)    # 8-aligned sublane slices
    n_blocks = -(-N // b_tile)
    n_pad = n_blocks * b_tile

    cdt = m1.dtype
    # Layout-only prep (fused under jit): NCHW -> channel-last, pad, flatten (W, C),
    # pad batch to the tile multiple, pre-gather the ho1 overlapping kh-row windows
    # (im2row over H only, ~1.27x the tiny activation) and order rows
    # (block, ho, b_local) so the kernel needs zero gather / relayout work.
    x = jnp.transpose(x_nchw, (0, 2, 3, 1)).astype(cdt)
    x = jnp.pad(x, ((0, n_pad - N), (ph, ph), (pw, pw), (0, 0))).reshape(n_pad, hp, wpc)
    wins = jnp.concatenate(
        [x[:, ho * sh: ho * sh + kh, :].reshape(n_pad, 1, k1) for ho in range(ho1)],
        axis=1)                                          # (n_pad, ho1, k1)
    xw = wins.reshape(n_blocks, b_tile, ho1, k1).transpose(0, 2, 1, 3)
    xw = xw.reshape(n_blocks, ho1 * b_tile, k1)          # rows: ho*b_tile + b_local

    c1 = m1.shape[1]
    k2, c2 = m2.shape
    flops = 2 * n_pad * (ho1 * k1 * c1 + k2 * c2 + c2 * out_lanes)
    bytes_accessed = (xw.size * xw.dtype.itemsize
                      + sum(a.size * a.dtype.itemsize for a in params)
                      + n_pad * out_lanes * 4)

    out = pl.pallas_call(
        functools.partial(_fused_encoder_kernel, ho1=ho1),
        out_shape=jax.ShapeDtypeStruct((n_blocks, b_tile, out_lanes), jnp.float32),
        grid=(n_blocks,),
        in_specs=[
            pl.BlockSpec((1, ho1 * b_tile, k1), lambda n: (n, 0, 0)),  # batch tile
            pl.BlockSpec(m1.shape, lambda n: (0, 0)),    # weights: constant index maps,
            pl.BlockSpec(v1.shape, lambda n: (0, 0)),    # fetched once / kept resident
            pl.BlockSpec(m2.shape, lambda n: (0, 0)),
            pl.BlockSpec(v2.shape, lambda n: (0, 0)),
            pl.BlockSpec(m3.shape, lambda n: (0, 0)),
            pl.BlockSpec(v3.shape, lambda n: (0, 0)),
        ],
        out_specs=pl.BlockSpec((1, b_tile, out_lanes), lambda n: (n, 0, 0)),
        compiler_params=pltpu.CompilerParams(dimension_semantics=("parallel",)),
        cost_estimate=pl.CostEstimate(flops=flops, transcendentals=0,
                                      bytes_accessed=bytes_accessed),
    )(xw, m1, v1, m2, v2, m3, v3)

    out = out.reshape(n_pad, out_lanes)[:N, :wo3]
    return out.reshape(N, 1, 1, wo3)                     # NCHW (N, Cout=1, Ho3=1, Wo3)


# ---------------------------------- module ------------------------------------
class ImageEncoderPallas:
    """Pallas TPU port of ImageEncoder: 3x Conv2d((7,3), pad (3,1), stride (4,2)),
    ReLU between.  `weight_dtype=jnp.bfloat16` is the v6e/v7x knob (halves the
    dominant weight DMA, f32 accumulation; needs ~1e-2 test tolerance)."""

    def __init__(self, in_features, hidden_size, kernel_size=(7, 3), padding=(3, 1),
                 stride=(4, 2), key=None, weight_dtype=jnp.float32):
        self.kernel_size, self.padding, self.stride = kernel_size, padding, stride
        kh, kw = kernel_size
        ph, pw = padding
        sh, sw = stride
        cin, H, W = in_features
        key = jax.random.PRNGKey(42) if key is None else key
        ks = jax.random.split(key, 6)

        def _init(kw_, kb_, cout, cin_):
            fan_in = cin_ * kh * kw
            bound = 1.0 / math.sqrt(fan_in)
            w = jax.random.uniform(kw_, (cout, cin_, kh, kw), jnp.float32, -bound, bound)
            b = jax.random.uniform(kb_, (cout,), jnp.float32, -bound, bound)
            return w, b

        self.w1, self.b1 = _init(ks[0], ks[1], hidden_size, cin)
        self.w2, self.b2 = _init(ks[2], ks[3], hidden_size, hidden_size)
        self.w3, self.b3 = _init(ks[4], ks[5], 1, hidden_size)

        # Conv geometry for the configured in_features (baked into the fused kernel).
        ho1, wo1 = _conv_out(H, kh, ph, sh), _conv_out(W, kw, pw, sw)
        ho2, wo2 = _conv_out(ho1, kh, ph, sh), _conv_out(wo1, kw, pw, sw)
        ho3, wo3 = _conv_out(ho2, kh, ph, sh), _conv_out(wo2, kw, pw, sw)
        assert ho2 == 1 and ho3 == 1, "fused kernel assumes layers 2/3 collapse H to 1"
        assert wo3 <= OUT_LANES, "layer-3 output wider than the lane-dense slab"

        # Hoisted (init-time, once) weight prep: Toeplitz matmul weights + tiled biases.
        m1, v1 = _toeplitz_layer1(self.w1, self.b1, W + 2 * pw, sw, wo1)
        m2, v2 = _toeplitz_single_row(self.w2, self.b2, ho1, wo1, ph, pw, sw, wo2)
        m3_raw, v3_raw = _toeplitz_single_row(self.w3, self.b3, ho2, wo2, ph, pw, sw, wo3)
        # Layer 3: zero-pad to a full 128-lane weight/bias so the kernel does one
        # lane-dense MXU matmul instead of a per-column cross-lane reduce.
        m3 = np.zeros((m3_raw.shape[0], OUT_LANES), np.float32)
        m3[:, :wo3] = m3_raw
        v3 = np.zeros((1, OUT_LANES), np.float32)
        v3[:, :wo3] = v3_raw

        wd = weight_dtype
        self._params = (jnp.asarray(m1, wd), jnp.asarray(v1),
                        jnp.asarray(m2, wd), jnp.asarray(v2),
                        jnp.asarray(m3, wd), jnp.asarray(v3))

        self._fwd = jax.jit(functools.partial(
            _encoder_forward, kh=kh, sh=sh, ph=ph, pw=pw, ho1=ho1, wo3=wo3,
            out_lanes=OUT_LANES))

    def __call__(self, x_in):
        if x_in.ndim == 3:
            x_in = x_in[None]                            # unsqueeze(0)
        return self._fwd(x_in, self._params)


# --------------------------------- reference ----------------------------------
def _conv2d_ref(x, w, b, stride, padding):
    out = jax.lax.conv_general_dilated(
        x, w, window_strides=stride,
        padding=[(padding[0], padding[0]), (padding[1], padding[1])],
        dimension_numbers=("NCHW", "OIHW", "NCHW"))
    return out + b.reshape(1, -1, 1, 1)


def _ref_forward(enc, x_in):
    if x_in.ndim == 3:
        x_in = x_in[None]
    x = jnp.maximum(_conv2d_ref(x_in, enc.w1, enc.b1, enc.stride, enc.padding), 0.0)
    x = jnp.maximum(_conv2d_ref(x, enc.w2, enc.b2, enc.stride, enc.padding), 0.0)
    return _conv2d_ref(x, enc.w3, enc.b3, enc.stride, enc.padding)


# ----------------------------------- main --------------------------------------
if __name__ == "__main__":
    in_features = (4, 16, 16)    # (C, H, W), as the PyTorch module expects
    hidden_size = 32
    batch = 2

    key = jax.random.PRNGKey(0)
    x = jax.random.normal(key, (batch, *in_features), dtype=jnp.float32)

    enc = ImageEncoderPallas(in_features, hidden_size)
    out = jax.block_until_ready(enc(x))
    assert out.shape == (batch, 1, 1, 2), out.shape

    ref = jax.block_until_ready(_ref_forward(enc, x))
    assert jnp.allclose(out, ref, atol=1e-4, rtol=1e-4), float(jnp.max(jnp.abs(out - ref)))

    print("KERNEL_OK")
</pallas_src>

<mosaic_0001>
module attributes {stable_mosaic.version = 11 : i64} {
  func.func @_fused_encoder_kernel(%arg0: i32, %arg1: memref<1x4x504xf32, #tpu.memory_space<vmem>>, %arg2: memref<504x256xf32, #tpu.memory_space<vmem>>, %arg3: memref<1x256xf32, #tpu.memory_space<vmem>>, %arg4: memref<1024x128xf32, #tpu.memory_space<vmem>>, %arg5: memref<1x128xf32, #tpu.memory_space<vmem>>, %arg6: memref<128x128xf32, #tpu.memory_space<vmem>>, %arg7: memref<1x128xf32, #tpu.memory_space<vmem>>, %arg8: memref<1x1x128xf32, #tpu.memory_space<vmem>>) attributes {dimension_semantics = [#tpu.dimension_semantics<parallel>], iteration_bounds = array<i64: 2>, scalar_prefetch = 0 : i64, scratch_operands = 0 : i64, tpu.core_type = #tpu.core_type<tc>, window_params = [{transform_indices = @transform_0, window_bounds = array<i64: 1, 4, 504>}, {pipeline_mode = #tpu.pipeline_mode<synchronous>, transform_indices = @transform_1, window_bounds = array<i64: 504, 256>}, {pipeline_mode = #tpu.pipeline_mode<synchronous>, transform_indices = @transform_2, window_bounds = array<i64: 1, 256>}, {pipeline_mode = #tpu.pipeline_mode<synchronous>, transform_indices = @transform_3, window_bounds = array<i64: 1024, 128>}, {pipeline_mode = #tpu.pipeline_mode<synchronous>, transform_indices = @transform_4, window_bounds = array<i64: 1, 128>}, {pipeline_mode = #tpu.pipeline_mode<synchronous>, transform_indices = @transform_5, window_bounds = array<i64: 128, 128>}, {pipeline_mode = #tpu.pipeline_mode<synchronous>, transform_indices = @transform_6, window_bounds = array<i64: 1, 128>}, {transform_indices = @transform_7, window_bounds = array<i64: 1, 1, 128>}]} {
    %c0 = arith.constant 0 : index
    %c0_0 = arith.constant 0 : index
    %c0_1 = arith.constant 0 : index
    %0 = vector.load %arg1[%c0, %c0_0, %c0_1] : memref<1x4x504xf32, #tpu.memory_space<vmem>>, vector<1x4x504xf32>
    %1 = vector.shape_cast %0 : vector<1x4x504xf32> to vector<4x504xf32>
    %c0_2 = arith.constant 0 : index
    %c0_3 = arith.constant 0 : index
    %2 = vector.load %arg2[%c0_2, %c0_3] : memref<504x256xf32, #tpu.memory_space<vmem>>, vector<504x256xf32>
    %cst = arith.constant dense<0.000000e+00> : vector<4x256xf32>
    %3 = tpu.matmul %1, %2, %cst {dimension_numbers = #tpu.dot_dimension_numbers<[1], [0], [0], [1], [0, 0, 1, 1], [], []>} : vector<4x504xf32>, vector<504x256xf32>, vector<4x256xf32> -> vector<4x256xf32>
    %c0_4 = arith.constant 0 : index
    %c0_5 = arith.constant 0 : index
    %4 = vector.load %arg3[%c0_4, %c0_5] : memref<1x256xf32, #tpu.memory_space<vmem>>, vector<1x256xf32>
    %5 = vector.broadcast %4 : vector<1x256xf32> to vector<4x256xf32>
    %6 = arith.addf %3, %5 : vector<4x256xf32>
    %cst_6 = arith.constant 0.000000e+00 : f32
    %7 = vector.broadcast %cst_6 : f32 to vector<4x256xf32>
    %8 = arith.maximumf %6, %7 : vector<4x256xf32>
    %9 = vector.extract_strided_slice %8 {offsets = [0, 0], sizes = [1, 256], strides = [1, 1]} : vector<4x256xf32> to vector<1x256xf32>
    %c0_7 = arith.constant 0 : index
    %c0_8 = arith.constant 0 : index
    %10 = vector.load %arg4[%c0_7, %c0_8] : memref<1024x128xf32, #tpu.memory_space<vmem>>, vector<256x128xf32>
    %cst_9 = arith.constant dense<0.000000e+00> : vector<1x128xf32>
    %11 = tpu.matmul %9, %10, %cst_9 {dimension_numbers = #tpu.dot_dimension_numbers<[1], [0], [0], [1], [0, 0, 1, 1], [], []>} : vector<1x256xf32>, vector<256x128xf32>, vector<1x128xf32> -> vector<1x128xf32>
    %12 = vector.extract_strided_slice %8 {offsets = [1, 0], sizes = [1, 256], strides = [1, 1]} : vector<4x256xf32> to vector<1x256xf32>
    %c256 = arith.constant 256 : index
    %c0_10 = arith.constant 0 : index
    %13 = vector.load %arg4[%c256, %c0_10] : memref<1024x128xf32, #tpu.memory_space<vmem>>, vector<256x128xf32>
    %cst_11 = arith.constant dense<0.000000e+00> : vector<1x128xf32>
    %14 = tpu.matmul %12, %13, %cst_11 {dimension_numbers = #tpu.dot_dimension_numbers<[1], [0], [0], [1], [0, 0, 1, 1], [], []>} : vector<1x256xf32>, vector<256x128xf32>, vector<1x128xf32> -> vector<1x128xf32>
    %15 = arith.addf %11, %14 : vector<1x128xf32>
    %16 = vector.extract_strided_slice %8 {offsets = [2, 0], sizes = [1, 256], strides = [1, 1]} : vector<4x256xf32> to vector<1x256xf32>
    %c512 = arith.constant 512 : index
    %c0_12 = arith.constant 0 : index
    %17 = vector.load %arg4[%c512, %c0_12] : memref<1024x128xf32, #tpu.memory_space<vmem>>, vector<256x128xf32>
    %cst_13 = arith.constant dense<0.000000e+00> : vector<1x128xf32>
    %18 = tpu.matmul %16, %17, %cst_13 {dimension_numbers = #tpu.dot_dimension_numbers<[1], [0], [0], [1], [0, 0, 1, 1], [], []>} : vector<1x256xf32>, vector<256x128xf32>, vector<1x128xf32> -> vector<1x128xf32>
    %19 = arith.addf %15, %18 : vector<1x128xf32>
    %20 = vector.extract_strided_slice %8 {offsets = [3, 0], sizes = [1, 256], strides = [1, 1]} : vector<4x256xf32> to vector<1x256xf32>
    %c768 = arith.constant 768 : index
    %c0_14 = arith.constant 0 : index
    %21 = vector.load %arg4[%c768, %c0_14] : memref<1024x128xf32, #tpu.memory_space<vmem>>, vector<256x128xf32>
    %cst_15 = arith.constant dense<0.000000e+00> : vector<1x128xf32>
    %22 = tpu.matmul %20, %21, %cst_15 {dimension_numbers = #tpu.dot_dimension_numbers<[1], [0], [0], [1], [0, 0, 1, 1], [], []>} : vector<1x256xf32>, vector<256x128xf32>, vector<1x128xf32> -> vector<1x128xf32>
    %23 = arith.addf %19, %22 : vector<1x128xf32>
    %c0_16 = arith.constant 0 : index
    %c0_17 = arith.constant 0 : index
    %24 = vector.load %arg5[%c0_16, %c0_17] : memref<1x128xf32, #tpu.memory_space<vmem>>, vector<1x128xf32>
    %25 = arith.addf %23, %24 : vector<1x128xf32>
    %cst_18 = arith.constant 0.000000e+00 : f32
    %26 = vector.broadcast %cst_18 : f32 to vector<1x128xf32>
    %27 = arith.maximumf %25, %26 : vector<1x128xf32>
    %c0_19 = arith.constant 0 : index
    %c0_20 = arith.constant 0 : index
    %28 = vector.load %arg6[%c0_19, %c0_20] : memref<128x128xf32, #tpu.memory_space<vmem>>, vector<128x128xf32>
    %cst_21 = arith.constant dense<0.000000e+00> : vector<1x128xf32>
    %29 = tpu.matmul %27, %28, %cst_21 {dimension_numbers = #tpu.dot_dimension_numbers<[1], [0], [0], [1], [0, 0, 1, 1], [], []>} : vector<1x128xf32>, vector<128x128xf32>, vector<1x128xf32> -> vector<1x128xf32>
    %c0_22 = arith.constant 0 : index
    %c0_23 = arith.constant 0 : index
    %30 = vector.load %arg7[%c0_22, %c0_23] : memref<1x128xf32, #tpu.memory_space<vmem>>, vector<1x128xf32>
    %31 = arith.addf %29, %30 : vector<1x128xf32>
    %c0_24 = arith.constant 0 : index
    %c0_25 = arith.constant 0 : index
    %c0_26 = arith.constant 0 : index
    %32 = vector.load %arg8[%c0_24, %c0_25, %c0_26] : memref<1x1x128xf32, #tpu.memory_space<vmem>>, vector<1x1x128xf32>
    %33 = vector.shape_cast %32 : vector<1x1x128xf32> to vector<1x128xf32>
    %34 = vector.shape_cast %31 : vector<1x128xf32> to vector<1x1x128xf32>
    tpu.vector_store %arg8[%c0_24, %c0_25, %c0_26], %34 {strides = array<i32>} : memref<1x1x128xf32, #tpu.memory_space<vmem>>, vector<1x1x128xf32>,
    return
  }
  func.func @transform_0(%arg0: i32) -> (i32, i32, i32) {
    %c0_i32 = arith.constant 0 : i32
    %c0_i32_0 = arith.constant 0 : i32
    %c0_i32_1 = arith.constant 0 : i32
    return %arg0, %c0_i32, %c0_i32_0 : i32, i32, i32
  }
  func.func @transform_1(%arg0: i32) -> (i32, i32) {
    %c0_i32 = arith.constant 0 : i32
    %c0_i32_0 = arith.constant 0 : i32
    %c0_i32_1 = arith.constant 0 : i32
    return %c0_i32, %c0_i32_0 : i32, i32
  }
  func.func @transform_2(%arg0: i32) -> (i32, i32) {
    %c0_i32 = arith.constant 0 : i32
    %c0_i32_0 = arith.constant 0 : i32
    %c0_i32_1 = arith.constant 0 : i32
    return %c0_i32, %c0_i32_0 : i32, i32
  }
  func.func @transform_3(%arg0: i32) -> (i32, i32) {
    %c0_i32 = arith.constant 0 : i32
    %c0_i32_0 = arith.constant 0 : i32
    %c0_i32_1 = arith.constant 0 : i32
    return %c0_i32, %c0_i32_0 : i32, i32
  }
  func.func @transform_4(%arg0: i32) -> (i32, i32) {
    %c0_i32 = arith.constant 0 : i32
    %c0_i32_0 = arith.constant 0 : i32
    %c0_i32_1 = arith.constant 0 : i32
    return %c0_i32, %c0_i32_0 : i32, i32
  }
  func.func @transform_5(%arg0: i32) -> (i32, i32) {
    %c0_i32 = arith.constant 0 : i32
    %c0_i32_0 = arith.constant 0 : i32
    %c0_i32_1 = arith.constant 0 : i32
    return %c0_i32, %c0_i32_0 : i32, i32
  }
  func.func @transform_6(%arg0: i32) -> (i32, i32) {
    %c0_i32 = arith.constant 0 : i32
    %c0_i32_0 = arith.constant 0 : i32
    %c0_i32_1 = arith.constant 0 : i32
    return %c0_i32, %c0_i32_0 : i32, i32
  }
  func.func @transform_7(%arg0: i32) -> (i32, i32, i32) {
    %c0_i32 = arith.constant 0 : i32
    %c0_i32_0 = arith.constant 0 : i32
    %c0_i32_1 = arith.constant 0 : i32
    return %arg0, %c0_i32, %c0_i32_0 : i32, i32, i32
  }
}

</mosaic_0001>

<bundles_post_ra>
// kernel: _encoder_forward.1
= control target key start
LH: loop header
LB: loop body
LE: loop exit
PB: predicated region body
PF: predicated region fallthrough
CT: control target
= control target key end

     0   :  { %12 = vsyncpa [#allocation3], 0  ;;  %s2731_s0 = inlined_call_operand.vmem [shape: f32[2,4,504], index: 0, kind: input, shape index: {}]   ;;  %s2732_s1 = inlined_call_operand.vmem [shape: f32[504,256], index: 1, kind: input, shape index: {}]   ;;  %s2733_s2 = inlined_call_operand.vmem [shape: f32[1,256], index: 2, kind: input, shape index: {}]   ;;  %s2734_s3 = inlined_call_operand.vmem [shape: f32[1024,128], index: 3, kind: input, shape index: {}]   ;;  %s2735_s4 = inlined_call_operand.vmem [shape: f32[1,128], index: 4, kind: input, shape index: {}]   ;;  %s2736_s5 = inlined_call_operand.vmem [shape: f32[128,128], index: 5, kind: input, shape index: {}]   ;;  %s2737_s6 = inlined_call_operand.vmem [shape: f32[1,128], index: 6, kind: input, shape index: {}]   ;;  %s2738_s7 = inlined_call_operand.hbm [shape: f32[2,1,128], index: 7, kind: output, shape index: {}]  }
   0x1   :  { %14 = vsyncpa [#allocation3 + $0x1], 0  ;;  %s1786_s24 = smov 0   ;;  %s1788_s25 = smov 0  }
   0x2   :  { %s1790_s26 = smov 0   ;;  %s1792_s27 = smov 0  }
   0x3 LB: > { %s1807_s28 = sadd.s32 4294967295, %s1740_s27   ;;  %s1151_s29 = sadd.s32 4294967294, %s1740_s27   ;;  %s1740_s27 = sphi %s1792_s27, %s2744_s27   ;;  %s1736_s26 = sphi %s1790_s26, %s2743_s26   ;;  %s1732_s25 = sphi %s1788_s25, %s2742_s25   ;;  %s1728_s24 = sphi %s1786_s24, %s2741_s24  }
   0x4   : > { %s1811_s30 = sadd.s32 1, %s1740_s27   ;;  %s179_s8 = sadd.s32 1, %s1736_s26 }
   0x5   : > { %s176_s9 = ssub.s32 %s1740_s27, %s1811_s30  ;;  %p189_p0 = scmp.ne.s32.totalorder %s1736_s26, %s1732_s25 }
   0x6   : > { %p177_p1 = scmp.eq.s32.totalorder %s176_s9, 0  ;;  %p190_p2 = scmp.eq.s32.totalorder %s1807_s28, 1 }
   0x7   : > { %p195_p3 = scmp.ne.s32.totalorder %s1732_s25, %s1728_s24  ;;  %p196_p4 = scmp.eq.s32.totalorder %s1151_s29, 1 }
   0x8   : > { %s1822_s10 = scalar_select %p177_p1, %s1736_s26, %s179_s8  }
   0x9   : > { %p1824_p5 = por %p190_p2, %p189_p0  ;;  %p1828_p6 = por %p196_p4, %p195_p3 }
   0xa   : > { %p1154_p7 = scmp.ge.s32.totalorder %s1740_s27, 1  ;;  %p240_p8 = scmp.lt.s32.totalorder %s1740_s27, 3 }
   0xc   : > { %p241_p9 = pnand %p1154_p7, %p240_p8 }
   0xd   : > { %v279_v0 = vld [vmem:[%s2732_s1 + $0x8] sm:$0xff] (!%p241_p9)  ;;  %v281_v1 = vld [vmem:[%s2732_s1 + $0x18] sm:$0xff] (!%p241_p9)  ;;  %v278_v2 = vld [vmem:[%s2732_s1] sm:$0xff] (!%p241_p9)  ;;  %p271_p10 = scmp.lt.s32.totalorder (!%p241_p9), %s1807_s28, 1  ;;  %vm421_vm0 = vcmask (!%p241_p9), 982016   ;;  %vm1743_vm1 = vmmov (!%p241_p9), 0  }
   0xe   : > { %244 = sbr.rel (%p241_p9) target bundleno = 907 (0x38b), region = 48  ;;  %v1354_v3 = vpack.c.bf16 (!%p241_p9), %v281_v1, %v279_v0  ;;  %v280_v4 = vld [vmem:[%s2732_s1 + $0x10] sm:$0xff] (!%p241_p9)  ;;  %v283_v5 = vld [vmem:[%s2732_s1 + $0x28] sm:$0xff] (!%p241_p9)  ;;  %v285_v6 = vld [vmem:[%s2732_s1 + $0x38] sm:$0xff] (!%p241_p9)  ;;  %s1158_s15 = sshll.u32 (!%p241_p9), %s1807_s28, 4 }
   0xf   : > { %v1356_v7 = vpack.c.bf16 (!%p241_p9), %v280_v4, %v278_v2  ;;  %v1358_v8 = vpack.c.bf16 (!%p241_p9), %v285_v6, %v283_v5  ;;  %v282_v9 = vld [vmem:[%s2732_s1 + $0x20] sm:$0xff] (!%p241_p9)  ;;  %v284_v10 = vld [vmem:[%s2732_s1 + $0x30] sm:$0xff] (!%p241_p9)  ;;  %v287_v11 = vld [vmem:[%s2732_s1 + $0x48] sm:$0xff] (!%p241_p9) }
  0x10   : > { %1355 = vmatprep.subr.bf16.mxu0 (!%p241_p9), %v1354_v3  ;;  %v289_v12 = vld [vmem:[%s2732_s1 + $0x58] sm:$0xff] (!%p241_p9)  ;;  %v1360_v13 = vpack.c.bf16 (!%p241_p9), %v284_v10, %v282_v9  ;;  %v286_v15 = vld [vmem:[%s2732_s1 + $0x40] sm:$0xff] (!%p241_p9)  ;;  %v288_v16 = vld [vmem:[%s2732_s1 + $0x50] sm:$0xff] (!%p241_p9) }
  0x11   : > { %1357 = vmatpush1.bf16.msra.mxu0 (!%p241_p9), %v1356_v7  ;;  %v1362_v14 = vpack.c.bf16 (!%p241_p9), %v289_v12, %v287_v11  ;;  %v291_v17 = vld [vmem:[%s2732_s1 + $0x68] sm:$0xff] (!%p241_p9)  ;;  %v293_v18 = vld [vmem:[%s2732_s1 + $0x78] sm:$0xff] (!%p241_p9)  ;;  %v1364_v19 = vpack.c.bf16 (!%p241_p9), %v288_v16, %v286_v15  ;;  %v290_v21 = vld [vmem:[%s2732_s1 + $0x60] sm:$0xff] (!%p241_p9) }
  0x12   : > { %1359 = vmatprep.subr.bf16.mxu0 (!%p241_p9), %v1358_v8  ;;  %v1366_v20 = vpack.c.bf16 (!%p241_p9), %v293_v18, %v291_v17  ;;  %v292_v22 = vld [vmem:[%s2732_s1 + $0x70] sm:$0xff] (!%p241_p9)  ;;  %v295_v23 = vld [vmem:[%s2732_s1 + $0x88] sm:$0xff] (!%p241_p9)  ;;  %v297_v24 = vld [vmem:[%s2732_s1 + $0x98] sm:$0xff] (!%p241_p9) }
  0x13   : > { %v1368_v25 = vpack.c.bf16 (!%p241_p9), %v292_v22, %v290_v21  ;;  %v1370_v26 = vpack.c.bf16 (!%p241_p9), %v297_v24, %v295_v23  ;;  %v294_v27 = vld [vmem:[%s2732_s1 + $0x80] sm:$0xff] (!%p241_p9)  ;;  %v296_v28 = vld [vmem:[%s2732_s1 + $0x90] sm:$0xff] (!%p241_p9)  ;;  %v299_v29 = vld [vmem:[%s2732_s1 + $0xa8] sm:$0xff] (!%p241_p9) }
  0x14   : > { %v301_v30 = vld [vmem:[%s2732_s1 + $0xb8] sm:$0xff] (!%p241_p9)  ;;  %v1372_v31 = vpack.c.bf16 (!%p241_p9), %v296_v28, %v294_v27  ;;  %v298_v33 = vld [vmem:[%s2732_s1 + $0xa0] sm:$0xff] (!%p241_p9)  ;;  %v300_v34 = vld [vmem:[%s2732_s1 + $0xb0] sm:$0xff] (!%p241_p9) }
  0x15   : > { %1361 = vmatpush1.bf16.msra.mxu0 %v1360_v13  ;;  %s272_s21 = scalar_select %p271_p10, %s1807_s28, 1  ;;  %v1374_v32 = vpack.c.bf16 %v301_v30, %v299_v29  ;;  %v303_v35 = vld [vmem:[%s2732_s1 + $0xc8] sm:$0xff]  ;;  %v305_v36 = vld [vmem:[%s2732_s1 + $0xd8] sm:$0xff]  ;;  %v1376_v37 = vpack.c.bf16 %v300_v34, %v298_v33  ;;  %v302_v39 = vld [vmem:[%s2732_s1 + $0xc0] sm:$0xff] }
  0x16   : > { %1363 = vmatprep.subr.bf16.mxu0 %v1362_v14  ;;  %v1378_v38 = vpack.c.bf16 %v305_v36, %v303_v35  ;;  %v304_v40 = vld [vmem:[%s2732_s1 + $0xd0] sm:$0xff]  ;;  %v307_v42 = vld [vmem:[%s2732_s1 + $0xe8] sm:$0xff]  ;;  %v309_v43 = vld [vmem:[%s2732_s1 + $0xf8] sm:$0xff]  ;;  %s1745_s28 = smov [#allocation2]  }
  0x17   : > { %s1161_s16 = sshll.u32 %s272_s21, 4  ;;  %v1380_v45 = vpack.c.bf16 %v304_v40, %v302_v39  ;;  %v1382_v46 = vpack.c.bf16 %v309_v43, %v307_v42  ;;  %v306_v47 = vld [vmem:[%s2732_s1 + $0xe0] sm:$0xff]  ;;  %v308_v48 = vld [vmem:[%s2732_s1 + $0xf0] sm:$0xff]  ;;  %v311_v49 = vld [vmem:[%s2732_s1 + $0x108] sm:$0xff]  ;;  %s269_s21 = sand.u32 1, %s1732_s25  }
  0x18   : > { %s1917_s13 = scalar_lea.vmem %s2731_s0, %s1161_s16  ;;  %v313_v50 = vld [vmem:[%s2732_s1 + $0x118] sm:$0xff]  ;;  %v1384_v51 = vpack.c.bf16 %v308_v48, %v306_v47  ;;  %v310_v53 = vld [vmem:[%s2732_s1 + $0x100] sm:$0xff]  ;;  %v312_v54 = vld [vmem:[%s2732_s1 + $0x110] sm:$0xff]  ;;  %s270_s17 = scalar_lea.vmem [#allocation2], %s269_s21 }
  0x19   : > { %1365 = vmatpush1.bf16.msra.mxu0 %v1364_v19  ;;  %v1926_v41 = vld [vmem:[%s1917_s13] sm:$0xff]  ;;  %v1386_v52 = vpack.c.bf16 %v313_v50, %v311_v49  ;;  %v315_v55 = vld [vmem:[%s2732_s1 + $0x128] sm:$0xff]  ;;  %v317_v56 = vld [vmem:[%s2732_s1 + $0x138] sm:$0xff]  ;;  %v1388_v57 = vpack.c.bf16 %v312_v54, %v310_v53  ;;  %s1096_s18 = sshll.u32 %s270_s17, 4  ;;  %s1084_s16 = scalar_lea.sflag [#allocation3], %s269_s21  ;;  %s2691_s18 = int_to_ptr.vmem [resolvable:$true] %s1096_s18 }
  0x1a   : > { %1367 = vmatprep.subr.bf16.mxu0 %v1366_v20  ;;  %v418_v44 = vcombine.high %v1926_v41, %v1926_v41  ;;  %v1390_v58 = vpack.c.bf16 %v317_v56, %v315_v55  ;;  %v314_v59 = vld [vmem:[%s2732_s1 + $0x120] sm:$0xff]  ;;  %v316_v60 = vld [vmem:[%s2732_s1 + $0x130] sm:$0xff]  ;;  %v319_v61 = vld [vmem:[%s2732_s1 + $0x148] sm:$0xff]  ;;  %s1678_s22 = scalar_lea.vmem %s2691_s18, 16  ;;  %s1682_s23 = sshll.u32 %s1745_s28, 4  ;;  %s1683_s23 = int_to_ptr.vmem [resolvable:$false] %s1682_s23 }
  0x1b   : > { %v321_v62 = vld [vmem:[%s2732_s1 + $0x158] sm:$0xff]  ;;  %v1392_v63 = vpack.c.bf16 %v316_v60, %v314_v59  ;;  %v318_v1 = vld [vmem:[%s2732_s1 + $0x140] sm:$0xff]  ;;  %v320_v2 = vld [vmem:[%s2732_s1 + $0x150] sm:$0xff]  ;;  %p1679_p11 = scmp.ne.s32.totalorder %s2691_s18, %s1678_s22  ;;  %s1684_s29 = scalar_lea.vmem %s1683_s23, 32 }
  0x1c   : > { %488 = vmatprep.mubr.f32.mxu0 %v418_v44  ;;  %v1394_v0 = vpack.c.bf16 %v321_v62, %v319_v61  ;;  %v323_v3 = vld [vmem:[%s2732_s1 + $0x168] sm:$0xff]  ;;  %v325_v4 = vld [vmem:[%s2732_s1 + $0x178] sm:$0xff]  ;;  %v1396_v5 = vpack.c.bf16 %v320_v2, %v318_v1  ;;  %v322_v7 = vld [vmem:[%s2732_s1 + $0x160] sm:$0xff]  ;;  %p1685_p0 = scmp.lt.s32.totalorder %s2691_s18, %s1683_s23  ;;  %p1686_p1 = scmp.lt.s32.totalorder %s1684_s29, %s1678_s22 }
  0x1d   : > { %1369 = vmatpush1.bf16.msra.mxu0 %v1368_v25  ;;  %v1398_v6 = vpack.c.bf16 %v325_v4, %v323_v3  ;;  %v324_v8 = vld [vmem:[%s2732_s1 + $0x170] sm:$0xff]  ;;  %v327_v9 = vld [vmem:[%s2732_s1 + $0x188] sm:$0xff]  ;;  %v329_v10 = vld [vmem:[%s2732_s1 + $0x198] sm:$0xff]  ;;  %p1680_p12 = pnand %p1679_p11, %p1824_p5 }
  0x1e   : > { %1371 = vmatprep.subr.bf16.mxu0 %v1370_v26  ;;  %v616_v11 = vld [vmem:[%s2734_s3 + $0x180] sm:$0xff]  ;;  %v328_v13 = vld [vmem:[%s2732_s1 + $0x190] sm:$0xff]  ;;  %v617_v14 = vld [vmem:[%s2734_s3 + $0x188] sm:$0xff]  ;;  %v1400_v17 = vpack.c.bf16 %v324_v8, %v322_v7  ;;  %v1402_v23 = vpack.c.bf16 %v329_v10, %v327_v9  ;;  %p1687_p2 = por %p1686_p1, %p1685_p0 }
  0x1f   : > { %v326_v12 = vld [vmem:[%s2732_s1 + $0x180] sm:$0xff]  ;;  %v601_v16 = vld [vmem:[%s2734_s3 + $0x108] sm:$0xff]  ;;  %v1478_v18 = vpack.c.bf16 %v617_v14, %v616_v11  ;;  %v618_v20 = vld [vmem:[%s2734_s3 + $0x190] sm:$0xff]  ;;  %p1681_p13 = pneg %p1680_p12 }
  0x20   : > { %v600_v15 = vld [vmem:[%s2734_s3 + $0x100] sm:$0xff]  ;;  %v619_v21 = vld [vmem:[%s2734_s3 + $0x198] sm:$0xff]  ;;  %v602_v22 = vld [vmem:[%s2734_s3 + $0x110] sm:$0xff] }
  0x21   : > { %1373 = vmatpush1.bf16.msra.mxu0 %v1372_v31  ;;  %v1480_v19 = vpack.c.bf16 %v601_v16, %v600_v15  ;;  %v1482_v24 = vpack.c.bf16 %v619_v21, %v618_v20  ;;  %v603_v25 = vld [vmem:[%s2734_s3 + $0x118] sm:$0xff]  ;;  %v620_v26 = vld [vmem:[%s2734_s3 + $0x1a0] sm:$0xff]  ;;  %v621_v27 = vld [vmem:[%s2734_s3 + $0x1a8] sm:$0xff]  ;;  %1479 = vmatprep.subr.bf16.mxu1 %v1478_v18  ;;  %v1404_v31 = vpack.c.bf16 %v328_v13, %v326_v12  ;;  %p1688_p3 = pnand %p1687_p2, %p1681_p13 }
  0x22   : > { %1375 = vmatprep.subr.bf16.mxu0 %v1374_v32  ;;  %v331_v28 = vld [vmem:[%s2732_s1 + $0x1a8] sm:$0xff]  ;;  %v333_v29 = vld [vmem:[%s2732_s1 + $0x1b8] sm:$0xff]  ;;  %v1484_v30 = vpack.c.bf16 %v603_v25, %v602_v22  ;;  %v330_v32 = vld [vmem:[%s2732_s1 + $0x1a0] sm:$0xff]  ;;  %v1486_v33 = vpack.c.bf16 %v621_v27, %v620_v26 }
  0x23   : > { %1481 = vmatpush3.bf16.msra.mxu1 %v1480_v19  ;;  %v604_v34 = vld [vmem:[%s2734_s3 + $0x120] sm:$0xff]  ;;  %v605_v35 = vld [vmem:[%s2734_s3 + $0x128] sm:$0xff]  ;;  %v1406_v36 = vpack.c.bf16 %v333_v29, %v331_v28  ;;  %v623_v39 = vld [vmem:[%s2734_s3 + $0x1b8] sm:$0xff] }
  0x24   : > { %1483 = vmatprep.subr.bf16.mxu1 %v1482_v24  ;;  %v335_v40 = vld [vmem:[%s2732_s1 + $0x1c8] sm:$0xff]  ;;  %v337_v42 = vld [vmem:[%s2732_s1 + $0x1d8] sm:$0xff]  ;;  %v1488_v43 = vpack.c.bf16 %v605_v35, %v604_v34  ;;  %v606_v47 = vld [vmem:[%s2734_s3 + $0x130] sm:$0xff] }
  0x25   : > { %1377 = vmatpush1.bf16.msra.mxu0 %v1376_v37  ;;  %v332_v37 = vld [vmem:[%s2732_s1 + $0x1b0] sm:$0xff]  ;;  %v607_v48 = vld [vmem:[%s2734_s3 + $0x138] sm:$0xff]  ;;  %v1410_v49 = vpack.c.bf16 %v337_v42, %v335_v40  ;;  %v339_v53 = vld [vmem:[%s2732_s1 + $0x1e8] sm:$0xff] }
  0x26   : > { %1379 = vmatprep.subr.bf16.mxu0 %v1378_v38  ;;  %v622_v38 = vld [vmem:[%s2734_s3 + $0x1b0] sm:$0xff]  ;;  %v1408_v44 = vpack.c.bf16 %v332_v37, %v330_v32  ;;  %v341_v54 = vld [vmem:[%s2732_s1 + $0x1f8] sm:$0xff]  ;;  %v1492_v55 = vpack.c.bf16 %v607_v48, %v606_v47  ;;  %v608_v59 = vld [vmem:[%s2734_s3 + $0x140] sm:$0xff] }
  0x27   : > { %1485 = vmatpush3.bf16.msra.mxu1 %v1484_v30  ;;  %v336_v50 = vld [vmem:[%s2732_s1 + $0x1d0] sm:$0xff]  ;;  %v609_v60 = vld [vmem:[%s2734_s3 + $0x148] sm:$0xff]  ;;  %v1414_v61 = vpack.c.bf16 %v341_v54, %v339_v53  ;;  %v345_v2 = vld [vmem:[%s2732_s1 + $0x218] sm:$0xff] }
  0x28   : > { %1487 = vmatprep.subr.bf16.mxu1 %v1486_v33  ;;  %v340_v62 = vld [vmem:[%s2732_s1 + $0x1f0] sm:$0xff]  ;;  %v343_v1 = vld [vmem:[%s2732_s1 + $0x208] sm:$0xff]  ;;  %v1496_v3 = vpack.c.bf16 %v609_v60, %v608_v59  ;;  %v611_v7 = vld [vmem:[%s2734_s3 + $0x158] sm:$0xff] }
  0x29   : > { %1381 = vmatpush1.bf16.msra.mxu0 %v1380_v45  ;;  %v334_v45 = vld [vmem:[%s2732_s1 + $0x1c0] sm:$0xff]  ;;  %v2117_v8 = vld [vmem:[%s1917_s13 + $0x8] sm:$0xff]  ;;  %v1418_v9 = vpack.c.bf16 %v345_v2, %v343_v1  ;;  %v344_v11 = vld [vmem:[%s2732_s1 + $0x210] sm:$0xff]  ;;  %s2689_s13 = scalar_lea.hbm %s2738_s7, %s1158_s15 }
  0x2a   : > { %1383 = vmatprep.subr.bf16.mxu0 %v1382_v46  ;;  %v1490_v46 = vpack.c.bf16 %v623_v39, %v622_v38  ;;  %v1412_v56 = vpack.c.bf16 %v336_v50, %v334_v45  ;;  %v342_v10 = vld [vmem:[%s2732_s1 + $0x200] sm:$0xff]  ;;  %v347_v12 = vld [vmem:[%s2732_s1 + $0x228] sm:$0xff]  ;;  %v349_v13 = vld [vmem:[%s2732_s1 + $0x238] sm:$0xff]  ;;  %v419_v15 = vcombine.high %v2117_v8, %v2117_v8 }
  0x2b   : > { %1489 = vmatpush3.bf16.msra.mxu1 %v1488_v43  ;;  %v1420_v16 = vpack.c.bf16 %v344_v11, %v342_v10  ;;  %v346_v18 = vld [vmem:[%s2732_s1 + $0x220] sm:$0xff]  ;;  %v348_v19 = vld [vmem:[%s2732_s1 + $0x230] sm:$0xff]  ;;  %v351_v20 = vld [vmem:[%s2732_s1 + $0x248] sm:$0xff] }
  0x2c   : > { %1491 = vmatprep.subr.bf16.mxu1 %v1490_v46  ;;  %v353_v21 = vld [vmem:[%s2732_s1 + $0x258] sm:$0xff]  ;;  %v1424_v22 = vpack.c.bf16 %v348_v19, %v346_v18  ;;  %v350_v24 = vld [vmem:[%s2732_s1 + $0x240] sm:$0xff]  ;;  %v352_v25 = vld [vmem:[%s2732_s1 + $0x250] sm:$0xff] }
  0x2d   : > { %1385 = vmatpush1.bf16.msra.mxu0 %v1384_v51  ;;  %v624_v51 = vld [vmem:[%s2734_s3 + $0x1c0] sm:$0xff]  ;;  %v355_v26 = vld [vmem:[%s2732_s1 + $0x268] sm:$0xff]  ;;  %v1428_v27 = vpack.c.bf16 %v352_v25, %v350_v24  ;;  %v356_v30 = vld [vmem:[%s2732_s1 + $0x270] sm:$0xff] }
  0x2e   : > { %1387 = vmatprep.subr.bf16.mxu0 %v1386_v52  ;;  %v625_v52 = vld [vmem:[%s2734_s3 + $0x1c8] sm:$0xff]  ;;  %v354_v29 = vld [vmem:[%s2732_s1 + $0x260] sm:$0xff]  ;;  %v361_v32 = vld [vmem:[%s2732_s1 + $0x298] sm:$0xff] }
  0x2f   : > { %1493 = vmatpush3.bf16.msra.mxu1 %v1492_v55  ;;  %v1432_v33 = vpack.c.bf16 %v356_v30, %v354_v29  ;;  %v358_v35 = vld [vmem:[%s2732_s1 + $0x280] sm:$0xff]  ;;  %v363_v37 = vld [vmem:[%s2732_s1 + $0x2a8] sm:$0xff]  ;;  %v365_v38 = vld [vmem:[%s2732_s1 + $0x2b8] sm:$0xff] }
  0x30   : > { %v1438_v40 = vpack.c.bf16 %v365_v38, %v363_v37  ;;  %v362_v42 = vld [vmem:[%s2732_s1 + $0x2a0] sm:$0xff]  ;;  %v364_v43 = vld [vmem:[%s2732_s1 + $0x2b0] sm:$0xff]  ;;  %v369_v45 = vld [vmem:[%s2732_s1 + $0x2d8] sm:$0xff] }
  0x31   : > { %1389 = vmatpush1.bf16.msra.mxu0 %v1388_v57  ;;  %v338_v57 = vld [vmem:[%s2732_s1 + $0x1e0] sm:$0xff]  ;;  %v1440_v46 = vpack.c.bf16 %v364_v43, %v362_v42  ;;  %v371_v50 = vld [vmem:[%s2732_s1 + $0x2e8] sm:$0xff]  ;;  %v372_v55 = vld [vmem:[%s2732_s1 + $0x2f0] sm:$0xff] }
  0x32   : > { %1391 = vmatprep.subr.bf16.mxu0 %v1390_v58  ;;  %v1494_v58 = vpack.c.bf16 %v625_v52, %v624_v51  ;;  %v1416_v4 = vpack.c.bf16 %v340_v62, %v338_v57  ;;  %v366_v48 = vld [vmem:[%s2732_s1 + $0x2c0] sm:$0xff]  ;;  %v373_v51 = vld [vmem:[%s2732_s1 + $0x2f8] sm:$0xff]  ;;  %v379_v62 = vld [vmem:[%s2732_s1 + $0x328] sm:$0xff] }
  0x33   : > { %v1446_v53 = vpack.c.bf16 %v373_v51, %v371_v50  ;;  %v370_v54 = vld [vmem:[%s2732_s1 + $0x2e0] sm:$0xff]  ;;  %v377_v57 = vld [vmem:[%s2732_s1 + $0x318] sm:$0xff]  ;;  %v384_v10 = vld [vmem:[%s2732_s1 + $0x350] sm:$0xff] }
  0x34   : > { %1495 = vmatprep.subr.bf16.mxu1 %v1494_v58  ;;  %v1448_v58 = vpack.c.bf16 %v372_v55, %v370_v54  ;;  %v374_v60 = vld [vmem:[%s2732_s1 + $0x300] sm:$0xff]  ;;  %v387_v11 = vld [vmem:[%s2732_s1 + $0x368] sm:$0xff]  ;;  %v393_v18 = vld [vmem:[%s2732_s1 + $0x398] sm:$0xff] }
  0x35   : > { %1393 = vmatpush1.bf16.msra.mxu0 %v1392_v63  ;;  %v626_v63 = vld [vmem:[%s2734_s3 + $0x1d0] sm:$0xff]  ;;  %1497 = vmatpush3.bf16.msra.mxu1 %v1496_v3  ;;  %v378_v2 = vld [vmem:[%s2732_s1 + $0x320] sm:$0xff]  ;;  %v397_v24 = vld [vmem:[%s2732_s1 + $0x3b8] sm:$0xff] }
  0x36   : > { %1395 = vmatprep.subr.bf16.mxu0 %v1394_v0  ;;  %v627_v0 = vld [vmem:[%s2734_s3 + $0x1d8] sm:$0xff]  ;;  %v380_v3 = vld [vmem:[%s2732_s1 + $0x330] sm:$0xff]  ;;  %v628_v37 = vld [vmem:[%s2734_s3 + $0x1e0] sm:$0xff] }
  0x37   : > { %v401_v29 = vld [vmem:[%s2732_s1 + $0x3d8] sm:$0xff]  ;;  %v629_v38 = vld [vmem:[%s2734_s3 + $0x1e8] sm:$0xff]  ;;  %v404_v55 = vld [vmem:[%s2733_s2] sm:$0x3] }
  0x38   : > { %v613_v42 = vld [vmem:[%s2734_s3 + $0x168] sm:$0xff] }
  0x39   : > { %1397 = vmatpush1.bf16.msra.mxu0 %v1396_v5  ;;  %v1498_v5 = vpack.c.bf16 %v627_v0, %v626_v63  ;;  %v381_v63 = vld [vmem:[%s2732_s1 + $0x338] sm:$0xff]  ;;  %v585_v50 = vld [vmem:[%s2734_s3 + $0x88] sm:$0xff] }
  0x3a   : > { %1399 = vmatprep.subr.bf16.mxu0 %v1398_v6  ;;  %v610_v6 = vld [vmem:[%s2734_s3 + $0x150] sm:$0xff]  ;;  %v1454_v1 = vpack.c.bf16 %v381_v63, %v379_v62 }
  0x3b   : > { %v1500_v14 = vpack.c.bf16 %v611_v7, %v610_v6  ;;  %1499 = vmatprep.subr.bf16.mxu1 %v1498_v5  ;;  %v385_v5 = vld [vmem:[%s2732_s1 + $0x358] sm:$0xff]  ;;  %v1456_v6 = vpack.c.bf16 %v380_v3, %v378_v2  ;;  %v586_v3 = vld [vmem:[%s2734_s3 + $0x90] sm:$0xff] }
  0x3d   : > { %1401 = vmatpush1.bf16.msra.mxu0 %v1400_v17  ;;  %v1422_v17 = vpack.c.bf16 %v349_v13, %v347_v12  ;;  %1501 = vmatpush3.bf16.msra.mxu1 %v1500_v14  ;;  %v389_v12 = vld [vmem:[%s2732_s1 + $0x378] sm:$0xff] }
  0x3e   : > { %1403 = vmatprep.subr.bf16.mxu0 %v1402_v23  ;;  %v1426_v23 = vpack.c.bf16 %v353_v21, %v351_v20  ;;  %v1462_v14 = vpack.c.bf16 %v389_v12, %v387_v11  ;;  %v390_v21 = vld [vmem:[%s2732_s1 + $0x380] sm:$0xff]  ;;  %v571_v11 = vld [vmem:[%s2734_s3 + $0x18] sm:$0xff] }
  0x3f   : > { %v588_v12 = vld [vmem:[%s2734_s3 + $0xa0] sm:$0xff] }
  0x41   : > { %1405 = vmatpush1.bf16.msra.mxu0 %v1404_v31  ;;  %v359_v31 = vld [vmem:[%s2732_s1 + $0x288] sm:$0xff] }
  0x42   : > { %1407 = vmatprep.subr.bf16.mxu0 %v1406_v36  ;;  %v1434_v34 = vpack.c.bf16 %v361_v32, %v359_v31  ;;  %v360_v36 = vld [vmem:[%s2732_s1 + $0x290] sm:$0xff]  ;;  %v398_v32 = vld [vmem:[%s2732_s1 + $0x3c0] sm:$0xff] }
  0x43   : > { %v1436_v39 = vpack.c.bf16 %v360_v36, %v358_v35  ;;  %v403_v35 = vld [vmem:[%s2732_s1 + $0x3e8] sm:$0xff]  ;;  %v402_v36 = vld [vmem:[%s2732_s1 + $0x3e0] sm:$0xff] }
  0x45   : > { %1409 = vmatpush1.bf16.msra.mxu0 %v1408_v44  ;;  %v367_v44 = vld [vmem:[%s2732_s1 + $0x2c8] sm:$0xff] }
  0x46   : > { %1411 = vmatprep.subr.bf16.mxu0 %v1410_v49  ;;  %v1442_v47 = vpack.c.bf16 %v369_v45, %v367_v44  ;;  %v368_v49 = vld [vmem:[%s2732_s1 + $0x2d0] sm:$0xff]  ;;  %v631_v44 = vld [vmem:[%s2734_s3 + $0x1f8] sm:$0xff] }
  0x47   : > { %v1444_v52 = vpack.c.bf16 %v368_v49, %v366_v48  ;;  %v584_v49 = vld [vmem:[%s2734_s3 + $0x80] sm:$0xff] }
  0x48   : > { %v1510_v51 = vpack.c.bf16 %v585_v50, %v584_v49 }
  0x49   : > { %1413 = vmatpush1.bf16.msra.mxu0 %v1412_v56  ;;  %v375_v56 = vld [vmem:[%s2732_s1 + $0x308] sm:$0xff] }
  0x4a   : > { %1415 = vmatprep.subr.bf16.mxu0 %v1414_v61  ;;  %v1450_v59 = vpack.c.bf16 %v377_v57, %v375_v56  ;;  %v376_v61 = vld [vmem:[%s2732_s1 + $0x310] sm:$0xff] }
  0x4b   : > { %v1452_v0 = vpack.c.bf16 %v376_v61, %v374_v60 }
  0x4d   : > { %1417 = vmatpush1.bf16.msra.mxu0 %v1416_v4  ;;  %v383_v4 = vld [vmem:[%s2732_s1 + $0x348] sm:$0xff] }
  0x4e   : > { %1419 = vmatprep.subr.bf16.mxu0 %v1418_v9  ;;  %v1458_v7 = vpack.c.bf16 %v385_v5, %v383_v4  ;;  %v382_v9 = vld [vmem:[%s2732_s1 + $0x340] sm:$0xff]  ;;  %v587_v4 = vld [vmem:[%s2734_s3 + $0x98] sm:$0xff] }
  0x4f   : > { %v1460_v13 = vpack.c.bf16 %v384_v10, %v382_v9  ;;  %v1514_v9 = vpack.c.bf16 %v587_v4, %v586_v3  ;;  %v570_v10 = vld [vmem:[%s2734_s3 + $0x10] sm:$0xff]  ;;  %v783_v3 = vld [vmem:[%s2734_s3 + $0x228] sm:$0xff] }
  0x50   : > { %489 = vmatmul.mubr.f32.vlgmr.msra.gmra.mrb[0].mxu0 %v1926_v41  ;;  %v357_v41 = vld [vmem:[%s2732_s1 + $0x278] sm:$0xff]  ;;  %v800_v4 = vld [vmem:[%s2734_s3 + $0x2b0] sm:$0xff] }
  0x51   : > { %1421 = vmatpush1.bf16.msra.mxu0 %v1420_v16  ;;  %1157 = vmatprep.mubr.msk.f32.mxu0 %vm421_vm0, %v419_v15  ;;  %v1430_v28 = vpack.c.bf16 %v357_v41, %v355_v26  ;;  %v386_v15 = vld [vmem:[%s2732_s1 + $0x360] sm:$0xff]  ;;  %v388_v16 = vld [vmem:[%s2732_s1 + $0x370] sm:$0xff] }
  0x52   : > { %1423 = vmatprep.subr.bf16.mxu0 %v1422_v17  ;;  %v391_v17 = vld [vmem:[%s2732_s1 + $0x388] sm:$0xff]  ;;  %v1464_v19 = vpack.c.bf16 %v388_v16, %v386_v15  ;;  %v394_v41 = vld [vmem:[%s2732_s1 + $0x3a0] sm:$0xff] }
  0x53   : > { %v1466_v20 = vpack.c.bf16 %v393_v18, %v391_v17  ;;  %v572_v16 = vld [vmem:[%s2734_s3 + $0x20] sm:$0xff]  ;;  %v573_v17 = vld [vmem:[%s2734_s3 + $0x28] sm:$0xff]  ;;  %v590_v18 = vld [vmem:[%s2734_s3 + $0xb0] sm:$0xff] }
  0x55   : > { %1425 = vmatpush1.bf16.msra.mxu0 %v1424_v22  ;;  %v392_v22 = vld [vmem:[%s2732_s1 + $0x390] sm:$0xff] }
  0x56   : > { %1427 = vmatprep.subr.bf16.mxu0 %v1426_v23  ;;  %v395_v23 = vld [vmem:[%s2732_s1 + $0x3a8] sm:$0xff]  ;;  %v1468_v25 = vpack.c.bf16 %v392_v22, %v390_v21  ;;  %v574_v22 = vld [vmem:[%s2734_s3 + $0x30] sm:$0xff] }
  0x57   : > { %v1470_v26 = vpack.c.bf16 %v397_v24, %v395_v23  ;;  %v575_v23 = vld [vmem:[%s2734_s3 + $0x38] sm:$0xff]  ;;  %v592_v24 = vld [vmem:[%s2734_s3 + $0xc0] sm:$0xff] }
  0x59   : > { %1429 = vmatpush1.bf16.msra.mxu0 %v1428_v27  ;;  %v396_v27 = vld [vmem:[%s2732_s1 + $0x3b0] sm:$0xff] }
  0x5a   : > { %1431 = vmatprep.subr.bf16.mxu0 %v1430_v28  ;;  %v399_v28 = vld [vmem:[%s2732_s1 + $0x3c8] sm:$0xff]  ;;  %v1472_v30 = vpack.c.bf16 %v396_v27, %v394_v41  ;;  %v576_v27 = vld [vmem:[%s2734_s3 + $0x40] sm:$0xff] }
  0x5b   : > { %v1474_v31 = vpack.c.bf16 %v401_v29, %v399_v28  ;;  %v577_v28 = vld [vmem:[%s2734_s3 + $0x48] sm:$0xff]  ;;  %v594_v29 = vld [vmem:[%s2734_s3 + $0xd0] sm:$0xff] }
  0x5d   : > { %1433 = vmatpush1.bf16.msra.mxu0 %v1432_v33  ;;  %v400_v33 = vld [vmem:[%s2732_s1 + $0x3d0] sm:$0xff] }
  0x5e   : > { %1435 = vmatprep.subr.bf16.mxu0 %v1434_v34  ;;  %v1476_v34 = vpack.c.bf16 %v400_v33, %v398_v32  ;;  %v578_v33 = vld [vmem:[%s2734_s3 + $0x50] sm:$0xff] }
  0x61   : > { %1437 = vmatpush1.bf16.msra.mxu0 %v1436_v39  ;;  %v1502_v39 = vpack.c.bf16 %v629_v38, %v628_v37 }
  0x62   : > { %1439 = vmatprep.subr.bf16.mxu0 %v1438_v40  ;;  %v612_v40 = vld [vmem:[%s2734_s3 + $0x160] sm:$0xff] }
  0x63   : > { %v1504_v43 = vpack.c.bf16 %v613_v42, %v612_v40  ;;  %1503 = vmatprep.subr.bf16.mxu1 %v1502_v39  ;;  %v580_v39 = vld [vmem:[%s2734_s3 + $0x60] sm:$0xff]  ;;  %v581_v40 = vld [vmem:[%s2734_s3 + $0x68] sm:$0xff]  ;;  %v598_v42 = vld [vmem:[%s2734_s3 + $0xf0] sm:$0xff] }
  0x65   : > { %1441 = vmatpush1.bf16.msra.mxu0 %v1440_v46  ;;  %1505 = vmatpush3.bf16.msra.mxu1 %v1504_v43  ;;  %v614_v46 = vld [vmem:[%s2734_s3 + $0x170] sm:$0xff]  ;;  %v599_v43 = vld [vmem:[%s2734_s3 + $0xf8] sm:$0xff] }
  0x66   : > { %1443 = vmatprep.subr.bf16.mxu0 %v1442_v47  ;;  %v615_v47 = vld [vmem:[%s2734_s3 + $0x178] sm:$0xff] }
  0x67   : > { %v1508_v48 = vpack.c.bf16 %v615_v47, %v614_v46  ;;  %v583_v46 = vld [vmem:[%s2734_s3 + $0x78] sm:$0xff]  ;;  %v794_v47 = vld [vmem:[%s2734_s3 + $0x280] sm:$0xff] }
  0x69   : > { %1445 = vmatpush1.bf16.msra.mxu0 %v1444_v52  ;;  %v406_v52 = vlaneseq }
  0x6a   : > { %1447 = vmatprep.subr.bf16.mxu0 %v1446_v53 }
  0x6b   : > { %v407_v53 = vshrl.u32 %v406_v52, 7  ;;  %v779_v52 = vld [vmem:[%s2734_s3 + $0x208] sm:$0xff] }
  0x6d   : > { %1449 = vmatpush1.bf16.msra.mxu0 %v1448_v58  ;;  %v408_v54 = vsub.s32 0, %v407_v53  ;;  %v412_v56 = vsub.s32 1, %v407_v53  ;;  %v796_v53 = vld [vmem:[%s2734_s3 + $0x290] sm:$0xff] }
  0x6e   : > { %1451 = vmatprep.subr.bf16.mxu0 %v1450_v59 }
  0x6f   : > { %v409_v57 = vrot.slane %v404_v55, %v408_v54  ;;  %v413_v58 = vrot.slane %v404_v55, %v412_v56  ;;  %v797_v54 = vld [vmem:[%s2734_s3 + $0x298] sm:$0xff] }
  0x70   : > { %v1546_v56 = vpack.c.bf16 %v797_v54, %v796_v53  ;;  %v907_v53 = vld [vmem:[%s2734_s3 + $0x3b0] sm:$0xff]  ;;  %v908_v54 = vld [vmem:[%s2734_s3 + $0x3b8] sm:$0xff] }
  0x71   : > { %1453 = vmatpush1.bf16.msra.mxu0 %v1452_v0  ;;  %v568_v0 = vld [vmem:[%s2734_s3] sm:$0xff] }
  0x72   : > { %1455 = vmatprep.subr.bf16.mxu0 %v1454_v1  ;;  %v569_v1 = vld [vmem:[%s2734_s3 + $0x8] sm:$0xff] }
  0x75   : > { %1457 = vmatpush1.bf16.msra.mxu0 %v1456_v6  ;;  %v1512_v6 = vpack.c.bf16 %v569_v1, %v568_v0  ;;  %v782_v1 = vld [vmem:[%s2734_s3 + $0x220] sm:$0xff] }
  0x76   : > { %1459 = vmatprep.subr.bf16.mxu0 %v1458_v7 }
  0x79   : > { %1461 = vmatpush1.bf16.msra.mxu0 %v1460_v13  ;;  %v589_v13 = vld [vmem:[%s2734_s3 + $0xa8] sm:$0xff] }
  0x7a   : > { %1463 = vmatprep.subr.bf16.mxu0 %v1462_v14  ;;  %v1516_v14 = vpack.c.bf16 %v571_v11, %v570_v10  ;;  %v1518_v15 = vpack.c.bf16 %v589_v13, %v588_v12  ;;  %v785_v10 = vld [vmem:[%s2734_s3 + $0x238] sm:$0xff]  ;;  %v802_v11 = vld [vmem:[%s2734_s3 + $0x2c0] sm:$0xff]  ;;  %v803_v12 = vld [vmem:[%s2734_s3 + $0x2c8] sm:$0xff] }
  0x7d   : > { %1465 = vmatpush1.bf16.msra.mxu0 %v1464_v19  ;;  %v591_v19 = vld [vmem:[%s2734_s3 + $0xb8] sm:$0xff] }
  0x7e   : > { %1467 = vmatprep.subr.bf16.mxu0 %v1466_v20  ;;  %v1520_v20 = vpack.c.bf16 %v573_v17, %v572_v16  ;;  %v1522_v21 = vpack.c.bf16 %v591_v19, %v590_v18  ;;  %v787_v16 = vld [vmem:[%s2734_s3 + $0x248] sm:$0xff]  ;;  %v804_v17 = vld [vmem:[%s2734_s3 + $0x2d0] sm:$0xff]  ;;  %v805_v18 = vld [vmem:[%s2734_s3 + $0x2d8] sm:$0xff] }
  0x81   : > { %1469 = vmatpush1.bf16.msra.mxu0 %v1468_v25  ;;  %v593_v25 = vld [vmem:[%s2734_s3 + $0xc8] sm:$0xff] }
  0x82   : > { %1471 = vmatprep.subr.bf16.mxu0 %v1470_v26  ;;  %v1524_v26 = vpack.c.bf16 %v575_v23, %v574_v22  ;;  %v1526_v41 = vpack.c.bf16 %v593_v25, %v592_v24  ;;  %v789_v22 = vld [vmem:[%s2734_s3 + $0x258] sm:$0xff]  ;;  %v806_v23 = vld [vmem:[%s2734_s3 + $0x2e0] sm:$0xff]  ;;  %v807_v24 = vld [vmem:[%s2734_s3 + $0x2e8] sm:$0xff] }
  0x85   : > { %1473 = vmatpush1.bf16.msra.mxu0 %v1472_v30  ;;  %v595_v30 = vld [vmem:[%s2734_s3 + $0xd8] sm:$0xff] }
  0x86   : > { %1475 = vmatprep.subr.bf16.mxu0 %v1474_v31  ;;  %v1528_v31 = vpack.c.bf16 %v577_v28, %v576_v27  ;;  %v1530_v32 = vpack.c.bf16 %v595_v30, %v594_v29  ;;  %v791_v27 = vld [vmem:[%s2734_s3 + $0x268] sm:$0xff]  ;;  %v808_v28 = vld [vmem:[%s2734_s3 + $0x2f0] sm:$0xff]  ;;  %v809_v29 = vld [vmem:[%s2734_s3 + $0x2f8] sm:$0xff] }
  0x89   : > { %1477 = vmatpush1.bf16.msra.mxu0 %v1476_v34  ;;  %v579_v34 = vld [vmem:[%s2734_s3 + $0x58] sm:$0xff] }
  0x8a   : > { %555 = vmatprep.subr.mxu0 %v403_v35  ;;  %v596_v35 = vld [vmem:[%s2734_s3 + $0xe0] sm:$0xff]  ;;  %v1532_v37 = vpack.c.bf16 %v579_v34, %v578_v33  ;;  %v793_v33 = vld [vmem:[%s2734_s3 + $0x278] sm:$0xff] }
  0x8b   : > { %v901_v34 = vld [vmem:[%s2734_s3 + $0x380] sm:$0xff] }
  0x8d   : > { %556 = vmatpush1.msra.mxu0 %v402_v36  ;;  %v597_v36 = vld [vmem:[%s2734_s3 + $0xe8] sm:$0xff] }
  0x8e   : > { %560 = vmatmul.mubr.f32.vlgmr.msra.gmra.mrb[0].mxu0 %v2117_v8  ;;  %v630_v8 = vld [vmem:[%s2734_s3 + $0x1f0] sm:$0xff]  ;;  %v1534_v38 = vpack.c.bf16 %v597_v36, %v596_v35  ;;  %v902_v35 = vld [vmem:[%s2734_s3 + $0x388] sm:$0xff] }
  0x8f   : > { %v1506_v45 = vpack.c.bf16 %v631_v44, %v630_v8  ;;  %v1536_v8 = vpack.c.bf16 %v581_v40, %v580_v39  ;;  %v1538_v44 = vpack.c.bf16 %v599_v43, %v598_v42  ;;  %v886_v39 = vld [vmem:[%s2734_s3 + $0x308] sm:$0xff]  ;;  %v903_v40 = vld [vmem:[%s2734_s3 + $0x390] sm:$0xff]  ;;  %v904_v42 = vld [vmem:[%s2734_s3 + $0x398] sm:$0xff] }
  0x91   : > { %1507 = vmatprep.subr.bf16.mxu1 %v1506_v45  ;;  %v582_v45 = vld [vmem:[%s2734_s3 + $0x70] sm:$0xff] }
  0x92   : > { %1509 = vmatpush3.bf16.msra.mxu1 %v1508_v48  ;;  %v795_v48 = vld [vmem:[%s2734_s3 + $0x288] sm:$0xff]  ;;  %v1540_v49 = vpack.c.bf16 %v583_v46, %v582_v45  ;;  %v887_v45 = vld [vmem:[%s2734_s3 + $0x310] sm:$0xff]  ;;  %v888_v46 = vld [vmem:[%s2734_s3 + $0x318] sm:$0xff] }
  0x93   : > { %1511 = vmatprep.subr.bf16.mxu1 %v1510_v51  ;;  %v1542_v50 = vpack.c.bf16 %v795_v48, %v794_v47  ;;  %v778_v51 = vld [vmem:[%s2734_s3 + $0x200] sm:$0xff] }
  0x94   : > { %v1544_v55 = vpack.c.bf16 %v779_v52, %v778_v51  ;;  %v905_v48 = vld [vmem:[%s2734_s3 + $0x3a0] sm:$0xff] }
  0x95   : > { %v889_v52 = vld [vmem:[%s2734_s3 + $0x320] sm:$0xff] }
 0x161   : > { %v561_v59 = vpop.f32.mrb[0].mxu0 }
 0x162   : > { %v1630_v60 = vadd.f32 %v561_v59, %v409_v57  ;;  %v563_v61 = vpop.f32.mrb[1].mxu0  ;;  %v780_v57 = vld [vmem:[%s2734_s3 + $0x210] sm:$0xff] }
 0x163   : > { %v1631_v62 = vadd.f32 %v563_v61, %v413_v58  ;;  %v781_v58 = vld [vmem:[%s2734_s3 + $0x218] sm:$0xff]  ;;  %v799_v61 = vld [vmem:[%s2734_s3 + $0x2a8] sm:$0xff] }
 0x164   : > { %v2336_v63 = vmax.f32 %v1630_v60, 0.0  ;;  %v798_v60 = vld [vmem:[%s2734_s3 + $0x2a0] sm:$0xff] }
 0x165   : > { %v2344_v2 = vmax.f32 %v1631_v62, 0.0  ;;  %v1548_v62 = vpack.c.bf16 %v781_v58, %v780_v57  ;;  %v1550_v0 = vpack.c.bf16 %v799_v61, %v798_v60  ;;  %v891_v57 = vld [vmem:[%s2734_s3 + $0x330] sm:$0xff]  ;;  %v892_v58 = vld [vmem:[%s2734_s3 + $0x338] sm:$0xff]  ;;  %v910_v60 = vld [vmem:[%s2734_s3 + $0x3c8] sm:$0xff] }
 0x166   : > { %v634_v7 = vrot.slane %v2336_v63, 1  ;;  %v1588_v61 = vpack.c.bf16 %v892_v58, %v891_v57 }
 0x167   : > { %v635_v5 = vrot.slane %v2344_v2, 1  ;;  %v811_v59 = vrot.slane %v2344_v2, 2  ;;  %v918_v47 = vrot.slane %v2344_v2, 3 }
 0x169   : > { %702 = vmatprep.mubr.f32.mxu1 %v635_v5  ;;  %v801_v5 = vld [vmem:[%s2734_s3 + $0x2b8] sm:$0xff] }
 0x16a   : > { %703 = vmatmul.mubr.f32.vlgmr.msra.gmra.mrb[0].mxu1 %v634_v7  ;;  %v1554_v7 = vpack.c.bf16 %v801_v5, %v800_v4  ;;  %v912_v4 = vld [vmem:[%s2734_s3 + $0x3d8] sm:$0xff] }
 0x16b   : > { %1513 = vmatpush3.bf16.msra.mxu1 %v1512_v6  ;;  %772 = vmatprep.mubr.f32.mxu1 %v2344_v2  ;;  %v1552_v6 = vpack.c.bf16 %v783_v3, %v782_v1  ;;  %v890_v2 = vld [vmem:[%s2734_s3 + $0x328] sm:$0xff]  ;;  %v911_v3 = vld [vmem:[%s2734_s3 + $0x3d0] sm:$0xff] }
 0x16c   : > { %1515 = vmatprep.subr.bf16.mxu1 %v1514_v9  ;;  %v784_v9 = vld [vmem:[%s2734_s3 + $0x230] sm:$0xff]  ;;  %v894_v1 = vld [vmem:[%s2734_s3 + $0x348] sm:$0xff] }
 0x16d   : > { %v1556_v13 = vpack.c.bf16 %v785_v10, %v784_v9  ;;  %v896_v9 = vld [vmem:[%s2734_s3 + $0x358] sm:$0xff]  ;;  %v913_v10 = vld [vmem:[%s2734_s3 + $0x3e0] sm:$0xff] }
 0x16f   : > { %1517 = vmatpush3.bf16.msra.mxu1 %v1516_v14  ;;  %v1558_v14 = vpack.c.bf16 %v803_v12, %v802_v11  ;;  %v914_v11 = vld [vmem:[%s2734_s3 + $0x3e8] sm:$0xff] }
 0x170   : > { %1519 = vmatprep.subr.bf16.mxu1 %v1518_v15  ;;  %v786_v15 = vld [vmem:[%s2734_s3 + $0x240] sm:$0xff] }
 0x171   : > { %v1560_v19 = vpack.c.bf16 %v787_v16, %v786_v15  ;;  %v898_v15 = vld [vmem:[%s2734_s3 + $0x368] sm:$0xff]  ;;  %v915_v16 = vld [vmem:[%s2734_s3 + $0x3f0] sm:$0xff] }
 0x173   : > { %1521 = vmatpush3.bf16.msra.mxu1 %v1520_v20  ;;  %v1562_v20 = vpack.c.bf16 %v805_v18, %v804_v17  ;;  %v916_v17 = vld [vmem:[%s2734_s3 + $0x3f8] sm:$0xff] }
 0x174   : > { %1523 = vmatprep.subr.bf16.mxu1 %v1522_v21  ;;  %v788_v21 = vld [vmem:[%s2734_s3 + $0x250] sm:$0xff] }
 0x175   : > { %v1564_v25 = vpack.c.bf16 %v789_v22, %v788_v21  ;;  %v900_v21 = vld [vmem:[%s2734_s3 + $0x378] sm:$0xff] }
 0x177   : > { %1525 = vmatpush3.bf16.msra.mxu1 %v1524_v26  ;;  %v1566_v26 = vpack.c.bf16 %v807_v24, %v806_v23  ;;  %v917_v23 = vrot.slane %v2336_v63, 3  ;;  %v995_v24 = vld [vmem:[%s2736_s5] sm:$0xff] }
 0x178   : > { %1527 = vmatprep.subr.bf16.mxu1 %v1526_v41  ;;  %v790_v41 = vld [vmem:[%s2734_s3 + $0x260] sm:$0xff] }
 0x179   : > { %v1568_v30 = vpack.c.bf16 %v791_v27, %v790_v41  ;;  %v1742_v41 = vmov 0.0|0.0  }
 0x17a   : > { %1606 = vmatprep.subr.bf16.mxu0 %v1742_v41 }
 0x17b   : > { %1529 = vmatpush3.bf16.msra.mxu1 %v1528_v31  ;;  %v1570_v31 = vpack.c.bf16 %v809_v29, %v808_v28  ;;  %v999_v29 = vld [vmem:[%s2736_s5 + $0x20] sm:$0xff] }
 0x17c   : > { %1531 = vmatprep.subr.bf16.mxu1 %v1530_v32  ;;  %v792_v32 = vld [vmem:[%s2734_s3 + $0x270] sm:$0xff] }
 0x17d   : > { %v1572_v36 = vpack.c.bf16 %v793_v33, %v792_v32  ;;  %v1001_v32 = vld [vmem:[%s2736_s5 + $0x30] sm:$0xff]  ;;  %v1002_v33 = vld [vmem:[%s2736_s5 + $0x38] sm:$0xff] }
 0x17f   : > { %1533 = vmatpush3.bf16.msra.mxu1 %v1532_v37  ;;  %v1574_v37 = vpack.c.bf16 %v902_v35, %v901_v34  ;;  %v1616_v34 = vpack.c.bf16 %v1002_v33, %v1001_v32  ;;  %v1003_v35 = vld [vmem:[%s2736_s5 + $0x40] sm:$0xff] }
 0x180   : > { %1535 = vmatprep.subr.bf16.mxu1 %v1534_v38  ;;  %v885_v38 = vld [vmem:[%s2734_s3 + $0x300] sm:$0xff] }
 0x181   : > { %v1576_v43 = vpack.c.bf16 %v886_v39, %v885_v38  ;;  %v1005_v38 = vld [vmem:[%s2736_s5 + $0x50] sm:$0xff]  ;;  %v1006_v39 = vld [vmem:[%s2736_s5 + $0x58] sm:$0xff] }
 0x183   : > { %1537 = vmatpush3.bf16.msra.mxu1 %v1536_v8  ;;  %v810_v8 = vrot.slane %v2336_v63, 2 }
 0x184   : > { %1539 = vmatprep.subr.bf16.mxu1 %v1538_v44  ;;  %v1578_v44 = vpack.c.bf16 %v904_v42, %v903_v40  ;;  %v1622_v40 = vpack.c.bf16 %v1006_v39, %v1005_v38  ;;  %v1007_v42 = vld [vmem:[%s2736_s5 + $0x60] sm:$0xff] }
 0x187   : > { %1541 = vmatpush3.bf16.msra.mxu1 %v1540_v49  ;;  %v906_v49 = vld [vmem:[%s2734_s3 + $0x3a8] sm:$0xff] }
 0x188   : > { %1543 = vmatprep.subr.bf16.mxu1 %v1542_v50  ;;  %v1580_v50 = vpack.c.bf16 %v888_v46, %v887_v45  ;;  %v1582_v51 = vpack.c.bf16 %v906_v49, %v905_v48  ;;  %v1010_v45 = vld [vmem:[%s2736_s5 + $0x78] sm:$0xff] }
 0x18a   : > { %773 = vmatmul.mubr.f32.vlgmr.msra.gmra.mrb[2].mxu1 %v2336_v63  ;;  %v998_v63 = vld [vmem:[%s2736_s5 + $0x18] sm:$0xff] }
 0x18b   : > { %1545 = vmatpush3.bf16.msra.mxu1 %v1544_v55  ;;  %878 = vmatprep.mubr.f32.mxu1 %v811_v59  ;;  %v1584_v55 = vpack.c.bf16 %v890_v2, %v889_v52  ;;  %v909_v59 = vld [vmem:[%s2734_s3 + $0x3c0] sm:$0xff] }
 0x18c   : > { %1547 = vmatprep.subr.bf16.mxu1 %v1546_v56  ;;  %v1586_v56 = vpack.c.bf16 %v908_v54, %v907_v53 }
 0x18f   : > { %1549 = vmatpush3.bf16.msra.mxu1 %v1548_v62  ;;  %v1590_v62 = vpack.c.bf16 %v910_v60, %v909_v59 }
 0x190   : > { %1551 = vmatprep.subr.bf16.mxu1 %v1550_v0  ;;  %v893_v0 = vld [vmem:[%s2734_s3 + $0x340] sm:$0xff] }
 0x191   : > { %v1592_v5 = vpack.c.bf16 %v894_v1, %v893_v0 }
 0x193   : > { %1553 = vmatpush3.bf16.msra.mxu1 %v1552_v6  ;;  %v1594_v6 = vpack.c.bf16 %v912_v4, %v911_v3  ;;  %v1011_v3 = vld [vmem:[%s2737_s6] sm:$0x1] }
 0x194   : > { %1555 = vmatprep.subr.bf16.mxu1 %v1554_v7  ;;  %v895_v7 = vld [vmem:[%s2734_s3 + $0x350] sm:$0xff] }
 0x195   : > { %v1596_v12 = vpack.c.bf16 %v896_v9, %v895_v7 }
 0x197   : > { %1557 = vmatpush3.bf16.msra.mxu1 %v1556_v13  ;;  %v1598_v13 = vpack.c.bf16 %v914_v11, %v913_v10 }
 0x198   : > { %1559 = vmatprep.subr.bf16.mxu1 %v1558_v14  ;;  %v897_v14 = vld [vmem:[%s2734_s3 + $0x360] sm:$0xff] }
 0x199   : > { %v1600_v18 = vpack.c.bf16 %v898_v15, %v897_v14 }
 0x19b   : > { %1561 = vmatpush3.bf16.msra.mxu1 %v1560_v19  ;;  %v1602_v19 = vpack.c.bf16 %v916_v17, %v915_v16 }
 0x19c   : > { %1563 = vmatprep.subr.bf16.mxu1 %v1562_v20  ;;  %v899_v20 = vld [vmem:[%s2734_s3 + $0x370] sm:$0xff] }
 0x19d   : > { %v1604_v22 = vpack.c.bf16 %v900_v21, %v899_v20 }
 0x19f   : > { %1565 = vmatpush3.bf16.msra.mxu1 %v1564_v25  ;;  %v996_v25 = vld [vmem:[%s2736_s5 + $0x8] sm:$0xff] }
 0x1a0   : > { %1567 = vmatprep.subr.bf16.mxu1 %v1566_v26  ;;  %v997_v26 = vld [vmem:[%s2736_s5 + $0x10] sm:$0xff]  ;;  %v1607_v27 = vpack.c.bf16 %v996_v25, %v995_v24 }
 0x1a1   : > { %v1610_v28 = vpack.c.bf16 %v998_v63, %v997_v26 }
 0x1a2   : > { %1608 = vmatpush3.bf16.msra.mxu0 %v1607_v27 }
 0x1a3   : > { %1569 = vmatpush3.bf16.msra.mxu1 %v1568_v30  ;;  %1609 = vmatprep.subr.bf16.mxu0 %v1742_v41  ;;  %v1000_v30 = vld [vmem:[%s2736_s5 + $0x28] sm:$0xff] }
 0x1a4   : > { %1571 = vmatprep.subr.bf16.mxu1 %v1570_v31  ;;  %v1613_v31 = vpack.c.bf16 %v1000_v30, %v999_v29 }
 0x1a6   : > { %1611 = vmatpush3.bf16.msra.mxu0 %v1610_v28 }
 0x1a7   : > { %1573 = vmatpush3.bf16.msra.mxu1 %v1572_v36  ;;  %1612 = vmatprep.subr.bf16.mxu0 %v1742_v41  ;;  %v1004_v36 = vld [vmem:[%s2736_s5 + $0x48] sm:$0xff] }
 0x1a8   : > { %1575 = vmatprep.subr.bf16.mxu1 %v1574_v37  ;;  %v1619_v37 = vpack.c.bf16 %v1004_v36, %v1003_v35 }
 0x1aa   : > { %879 = vmatmul.mubr.f32.vlgmr.msra.gmra.mrb[4].mxu1 %v810_v8  ;;  %1614 = vmatpush3.bf16.msra.mxu0 %v1613_v31 }
 0x1ab   : > { %1577 = vmatpush3.bf16.msra.mxu1 %v1576_v43  ;;  %985 = vmatprep.mubr.f32.mxu1 %v918_v47  ;;  %v1008_v43 = vld [vmem:[%s2736_s5 + $0x68] sm:$0xff]  ;;  %v1744_v47 = vmov 0.0  }
 0x1ac   : > { %1579 = vmatprep.subr.bf16.mxu1 %v1578_v44  ;;  %1615 = vmatprep.subr.bf16.mxu0 %v1742_v41  ;;  %v1625_v8 = vpack.c.bf16 %v1008_v43, %v1007_v42  ;;  %v1009_v44 = vld [vmem:[%s2736_s5 + $0x70] sm:$0xff] }
 0x1ad   : > { %v1628_v46 = vpack.c.bf16 %v1010_v45, %v1009_v44  ;;  %1351 = vmatprep.mubr.msk.f32.mxu0 %vm1743_vm1, %v1744_v47 }
 0x1ae   : > { %1617 = vmatpush3.bf16.msra.mxu0 %v1616_v34 }
 0x1af   : > { %1581 = vmatpush3.bf16.msra.mxu1 %v1580_v50  ;;  %1618 = vmatprep.subr.bf16.mxu0 %v1742_v41 }
 0x1b0   : > { %1583 = vmatprep.subr.bf16.mxu1 %v1582_v51 }
 0x1b2   : > { %1620 = vmatpush3.bf16.msra.mxu0 %v1619_v37 }
 0x1b3   : > { %1585 = vmatpush3.bf16.msra.mxu1 %v1584_v55  ;;  %1621 = vmatprep.subr.bf16.mxu0 %v1742_v41 }
 0x1b4   : > { %1587 = vmatprep.subr.bf16.mxu1 %v1586_v56 }
 0x1b6   : > { %1623 = vmatpush3.bf16.msra.mxu0 %v1622_v40 }
 0x1b7   : > { %1589 = vmatpush3.bf16.msra.mxu1 %v1588_v61  ;;  %1624 = vmatprep.subr.bf16.mxu0 %v1742_v41  ;;  %v992_v61 = vld [vmem:[%s2735_s4] sm:$0x1] }
 0x1b8   : > { %1591 = vmatprep.subr.bf16.mxu1 %v1590_v62 }
 0x1ba   : > { %1626 = vmatpush3.bf16.msra.mxu0 %v1625_v8 }
 0x1bb   : > { %1593 = vmatpush3.bf16.msra.mxu1 %v1592_v5  ;;  %1627 = vmatprep.subr.bf16.mxu0 %v1742_v41 }
 0x1bc   : > { %1595 = vmatprep.subr.bf16.mxu1 %v1594_v6 }
 0x1be   : > { %1629 = vmatpush3.bf16.msra.mxu0 %v1628_v46 }
 0x1bf   : > { %1597 = vmatpush3.bf16.msra.mxu1 %v1596_v12 }
 0x1c0   : > { %1599 = vmatprep.subr.bf16.mxu1 %v1598_v13 }
 0x1c3   : > { %1601 = vmatpush3.bf16.msra.mxu1 %v1600_v18 }
 0x1c4   : > { %1603 = vmatprep.subr.bf16.mxu1 %v1602_v19 }
 0x1c7   : > { %1605 = vmatpush3.bf16.msra.mxu1 %v1604_v22 }
 0x1ca   : > { %986 = vmatmul.mubr.f32.vlgmr.msra.gmra.mrb[6].mxu1 %v917_v23 }
 0x23d   : > { %v1194_v48 = vpop.f32.mrb[0].mxu1 }
 0x23e   : > { %v1195_v49 = vpop.f32.mrb[1].mxu1 }
 0x23f   : > { %v1196_v50 = vadd.f32 %v1195_v49, %v1194_v48 }
 0x25d   : > { %v1229_v51 = vpop.f32.mrb[2].mxu1 }
 0x25e   : > { %v1230_v52 = vpop.f32.mrb[3].mxu1 }
 0x25f   : > { %v1231_v2 = vadd.f32 %v1230_v52, %v1229_v51 }
 0x261   : > { %v775_v53 = vadd.f32 %v1231_v2, %v1196_v50 }
 0x27d   : > { %v1264_v54 = vpop.f32.mrb[4].mxu1 }
 0x27e   : > { %v1265_v55 = vpop.f32.mrb[5].mxu1 }
 0x27f   : > { %v1266_v56 = vadd.f32 %v1265_v55, %v1264_v54 }
 0x281   : > { %v884_v57 = vadd.f32 %v1266_v56, %v775_v53 }
 0x29d   : > { %v1299_v58 = vpop.f32.mrb[6].mxu1 }
 0x29e   : > { %v1300_v59 = vpop.f32.mrb[7].mxu1 }
 0x29f   : > { %v1301_v60 = vadd.f32 %v1300_v59, %v1299_v58 }
 0x2a1   : > { %v991_v62 = vadd.f32 %v1301_v60, %v884_v57 }
 0x2a3   : > { %v993_v0 = vadd.f32 %v992_v61, %v991_v62 }
 0x2a5   : > { %v994_v1 = vmax.f32 %v993_v0, 0.0 }
 0x2a7   : > { %1352 = vmatmul.mubr.f32.vlgmr.msra.gmra.mrb[2].mxu0 %v994_v1 }
 0x37a   : > { %v1078_v4 = vpop.f32.mrb[2].mxu0 }
 0x37b   : > { %v1079_v5 = vadd.f32 %v1078_v4, %v1011_v3  ;;  %v1353_v6 = vpop.f32.mrb[3].mxu0 }
 0x37d   : > { %1082 = vst [vmem:[%s270_s17] sm:$0x1] %v1079_v5 }
 0x37e   : > { %1691 = shalt.err (!%p1688_p3)
}
 0x37f   : > { %s1692_s8 = scalar_lea.hbm %s2689_s13, 16  ;;  %s1696_s14 = scalar_lea.hbm %s2738_s7, 32 }
 0x380   : > { %p1693_p4 = scmp.ne.s32.totalorder %s2689_s13, %s1692_s8  ;;  %p1697_p9 = scmp.lt.u32.totalorder %s2689_s13, %s2738_s7 }
 0x381   : > { %p1698_p10 = scmp.lt.u32.totalorder %s1696_s14, %s1692_s8  ;;  %p1700_p12 = scmp.lt.u32.totalorder %s1692_s8, %s2689_s13 }
 0x382   : > { %p1694_p7 = pnand %p1693_p4, %p1824_p5 }
 0x383   : > { %p1699_p11 = por %p1698_p10, %p1697_p9 }
 0x384   : > { %p1695_p8 = pneg %p1694_p7 }
 0x385   : > { %p1701_p13 = por %p1700_p12, %p1699_p11 }
 0x387   : > { %p1702_p0 = pnand %p1701_p13, %p1695_p8 }
 0x389   : > { %1705 = shalt.err (!%p1702_p0)
}
 0x38a   : > { %1634 = dma.vmem_to_hbm [thread:$0]  (%p1824_p5), %s2691_s18, 16, %s2689_s13, %s1084_s16  }
 0x38b PF: > { %p1640_p1 = scmp.ge.s32.totalorder %s1740_s27, 2  ;;  %s1108_s19 = sand.u32 1, %s1728_s24  }
 0x38c   : > { %s1109_s20 = scalar_lea.sflag [#allocation3], %s1108_s19 }
 0x38d   : > { %p1637_p2 = pnand %p1640_p1, %p1828_p6 }
 0x38f   : > { %1723 = dma.done.wait (!%p1637_p2), %s1109_s20, 16  }
 0x390   : > { %1725 = vsyncadd (!%p1637_p2), %s1109_s20, 4294967280  ;;  %p17_p3 = scmp.ge.s32.totalorder %s1811_s30, 4   ;;  %s2741_s24 = smov %s1732_s25 }
 0x391   : > { %s2742_s25 = smov %s1736_s26  ;;  %s2743_s26 = smov %s1822_s10 }
 0x392   : > { %s2744_s27 = smov %s1811_s30  ;;  %19 = sbr.rel (!%p17_p3) target bundleno = 3 (0x3), region = 83 }
 0x399   :  { %1113 = vsyncpa [#allocation3], 1 }
 0x39a   :  { %1115 = vsyncpa [#allocation3 + $0x1], 1 }

</bundles_post_ra>
